<compile_context>
chip_gen: v6e
topology: v6e:2x2x1
jax: 0.10.0
libtpu: 0.0.40
codegen_flags: <defaults>
</compile_context>

<pallas_src>
import functools

import jax
import jax.numpy as jnp
from jax.experimental import pallas as pl
from jax.experimental.pallas import tpu as pltpu


# tap -> (flat weight index, plane index, row offset, col offset) in the half-res planes,
# derived from input index (2i + 1 + di, 2j + 1 + dj); plane order [ee, eo, oe, oo]
# (first letter = row parity, second = col parity of the source pixel).  The center tap
# (w11 -> plane ee, offset (1,1)) is folded into the accumulator init together with bias.
_TAPS = (
    (0, 3, 0, 0),   # w00 -> oo
    (1, 2, 0, 1),   # w01 -> oe
    (2, 3, 0, 1),   # w02 -> oo
    (3, 1, 1, 0),   # w10 -> eo
    (5, 1, 1, 1),   # w12 -> eo
    (6, 3, 1, 0),   # w20 -> oo
    (7, 2, 1, 1),   # w21 -> oe
    (8, 3, 1, 1),   # w22 -> oo
)


def _conv_clamp_kernel(wb_ref, planes_ref, o_ref, *, cmin, cmax):
    """9-tap stride-2 conv + bias + clamp for one lane-block of images.

    wb_ref:     (10,) f32 in SMEM  -> [w00,w01,w02,w10,w11,w12,w20,w21,w22, bias]
    planes_ref: (4, Hp, Wp, B) in VMEM, batch on lanes, plane order [ee, eo, oe, oo]
    o_ref:      (Ho, Wo, B) f32 in VMEM
    """
    Ho, Wo, _ = o_ref.shape

    # bias + center tap folded into the init (offsets are on sublane/third-minor dims,
    # so taps are full-vreg VPU ops with no cross-lane shifts).
    acc = wb_ref[9] + wb_ref[4] * planes_ref[0, pl.ds(1, Ho), pl.ds(1, Wo), :]
    for widx, k, ro, co in _TAPS:
        acc = acc + wb_ref[widx] * planes_ref[k, pl.ds(ro, Ho), pl.ds(co, Wo), :]

    # clamp_min then clamp_max
    acc = jnp.maximum(acc, jnp.float32(cmin))
    acc = jnp.minimum(acc, jnp.float32(cmax))
    o_ref[...] = acc.astype(o_ref.dtype)


@functools.partial(jax.jit, static_argnames=("clamp_min", "clamp_max", "lane_block"))
def model_forward(x, weight, bias, clamp_min=-256.0, clamp_max=256.0, lane_block=128):
    """x: (N, 1, H, W) NCHW; weight: (1, 1, 3, 3); bias: (1,). Returns (N, 1, Ho, Wo)."""
    N, C, H, W = x.shape
    assert C == 1, "Model is Conv2d(1, 1, 3): single in/out channel"
    assert H % 2 == 0 and W % 2 == 0, "even spatial dims expected for even/odd deinterleave"

    Hp, Wp = H // 2, W // 2
    # padding = -1 crops one pixel per side; kernel = 3, stride = 2
    Ho = (H - 2 - 3) // 2 + 1
    Wo = (W - 2 - 3) // 2 + 1

    n_blocks = pl.cdiv(N, lane_block)
    Npad = n_blocks * lane_block

    imgs = x[:, 0]                                        # (N, H, W), keep native dtype
    if Npad != N:
        imgs = jnp.pad(imgs, ((0, Npad - N), (0, 0), (0, 0)))

    # Fused even/odd deinterleave + batch-to-lanes: a single XLA transpose copy.
    # planes[p, hp, wp, n] with p = 2*(h%2) + (w%2)  -> order [ee, eo, oe, oo].
    planes = imgs.reshape(Npad, Hp, 2, Wp, 2)
    planes = planes.transpose(2, 4, 1, 3, 0).reshape(4, Hp, Wp, Npad)

    # flat (9 weights + 1 bias) scalar vector for SMEM
    wb = jnp.concatenate([weight.reshape(9).astype(jnp.float32),
                          bias.reshape(1).astype(jnp.float32)])

    kernel = functools.partial(_conv_clamp_kernel,
                               cmin=float(clamp_min), cmax=float(clamp_max))

    out = pl.pallas_call(
        kernel,
        out_shape=jax.ShapeDtypeStruct((Ho, Wo, Npad), jnp.float32),
        grid_spec=pltpu.PrefetchScalarGridSpec(
            num_scalar_prefetch=0,
            grid=(n_blocks,),
            in_specs=[
                # weights + bias: tiny, whole array resident in SMEM across the grid
                pl.BlockSpec(memory_space=pltpu.MemorySpace.SMEM),
                # packed planes: one lane-block of images per grid step
                pl.BlockSpec((4, Hp, Wp, lane_block), lambda n: (0, 0, 0, n)),
            ],
            out_specs=pl.BlockSpec((Ho, Wo, lane_block), lambda n: (0, 0, n)),
        ),
        compiler_params=pltpu.CompilerParams(
            dimension_semantics=("parallel",)),   # shards batch blocks over v7x's 2 TCs
    )(wb, planes)

    # (Ho, Wo, Npad) -> (N, 1, Ho, Wo)
    return out.transpose(2, 0, 1)[:N, None, :, :]


if __name__ == "__main__":
    key = jax.random.PRNGKey(0)
    kx, kw, kb = jax.random.split(key, 3)

    # small batch of the module's own 32x32 single-channel inputs
    x1 = jax.random.normal(kx, (2, 1, 32, 32), dtype=jnp.float32)

    # deterministic Conv2d(1, 1, 3) parameters (PyTorch-style uniform bound 1/sqrt(9))
    bound = 1.0 / 3.0
    weight = jax.random.uniform(kw, (1, 1, 3, 3), jnp.float32, -bound, bound)
    bias = jax.random.uniform(kb, (1,), jnp.float32, -bound, bound)

    out = model_forward(x1, weight, bias, clamp_min=-256.0, clamp_max=256.0)
    out = jax.block_until_ready(out)

    # pure-JAX reference (XLA conv supports negative padding directly)
    ref = jax.lax.conv_general_dilated(
        x1, weight, window_strides=(2, 2), padding=((-1, -1), (-1, -1)),
        dimension_numbers=("NCHW", "OIHW", "NCHW"))
    ref = ref + bias.reshape(1, 1, 1, 1)
    ref = jnp.clip(ref, -256.0, 256.0)

    assert out.shape == (2, 1, 14, 14), out.shape
    assert jnp.allclose(out, ref, atol=1e-5, rtol=1e-5), \
        float(jnp.max(jnp.abs(out - ref)))
    print("KERNEL_OK")
</pallas_src>

<mosaic_0001>
module attributes {stable_mosaic.version = 11 : i64} {
  func.func @_conv_clamp_kernel(%arg0: i32, %arg1: memref<10xf32, #tpu.memory_space<smem>>, %arg2: memref<4x16x16x128xf32, #tpu.memory_space<vmem>>, %arg3: memref<14x14x128xf32, #tpu.memory_space<vmem>>) attributes {dimension_semantics = [#tpu.dimension_semantics<parallel>], iteration_bounds = array<i64: 1>, scalar_prefetch = 0 : i64, scratch_operands = 0 : i64, tpu.core_type = #tpu.core_type<tc>, window_params = [{transform_indices = @transform_0, window_bounds = array<i64: 10>}, {transform_indices = @transform_1, window_bounds = array<i64: 4, 16, 16, 128>}, {transform_indices = @transform_2, window_bounds = array<i64: 14, 14, 128>}]} {
    %c9 = arith.constant 9 : index
    %0 = memref.load %arg1[%c9] : memref<10xf32, #tpu.memory_space<smem>>
    %c4 = arith.constant 4 : index
    %1 = memref.load %arg1[%c4] : memref<10xf32, #tpu.memory_space<smem>>
    %c0 = arith.constant 0 : index
    %c1 = arith.constant 1 : index
    %c1_0 = arith.constant 1 : index
    %c0_1 = arith.constant 0 : index
    %2 = vector.load %arg2[%c0, %c1, %c1_0, %c0_1] : memref<4x16x16x128xf32, #tpu.memory_space<vmem>>, vector<1x14x14x128xf32>
    %3 = vector.shape_cast %2 : vector<1x14x14x128xf32> to vector<14x14x128xf32>
    %4 = vector.broadcast %1 : f32 to vector<14x14x128xf32>
    %5 = arith.mulf %4, %3 : vector<14x14x128xf32>
    %6 = vector.broadcast %0 : f32 to vector<14x14x128xf32>
    %7 = arith.addf %6, %5 : vector<14x14x128xf32>
    %c0_2 = arith.constant 0 : index
    %8 = memref.load %arg1[%c0_2] : memref<10xf32, #tpu.memory_space<smem>>
    %c3 = arith.constant 3 : index
    %c0_3 = arith.constant 0 : index
    %c0_4 = arith.constant 0 : index
    %c0_5 = arith.constant 0 : index
    %9 = vector.load %arg2[%c3, %c0_3, %c0_4, %c0_5] : memref<4x16x16x128xf32, #tpu.memory_space<vmem>>, vector<1x14x14x128xf32>
    %10 = vector.shape_cast %9 : vector<1x14x14x128xf32> to vector<14x14x128xf32>
    %11 = vector.broadcast %8 : f32 to vector<14x14x128xf32>
    %12 = arith.mulf %11, %10 : vector<14x14x128xf32>
    %13 = arith.addf %7, %12 : vector<14x14x128xf32>
    %c1_6 = arith.constant 1 : index
    %14 = memref.load %arg1[%c1_6] : memref<10xf32, #tpu.memory_space<smem>>
    %c2 = arith.constant 2 : index
    %c0_7 = arith.constant 0 : index
    %c1_8 = arith.constant 1 : index
    %c0_9 = arith.constant 0 : index
    %15 = vector.load %arg2[%c2, %c0_7, %c1_8, %c0_9] : memref<4x16x16x128xf32, #tpu.memory_space<vmem>>, vector<1x14x14x128xf32>
    %16 = vector.shape_cast %15 : vector<1x14x14x128xf32> to vector<14x14x128xf32>
    %17 = vector.broadcast %14 : f32 to vector<14x14x128xf32>
    %18 = arith.mulf %17, %16 : vector<14x14x128xf32>
    %19 = arith.addf %13, %18 : vector<14x14x128xf32>
    %c2_10 = arith.constant 2 : index
    %20 = memref.load %arg1[%c2_10] : memref<10xf32, #tpu.memory_space<smem>>
    %c3_11 = arith.constant 3 : index
    %c0_12 = arith.constant 0 : index
    %c1_13 = arith.constant 1 : index
    %c0_14 = arith.constant 0 : index
    %21 = vector.load %arg2[%c3_11, %c0_12, %c1_13, %c0_14] : memref<4x16x16x128xf32, #tpu.memory_space<vmem>>, vector<1x14x14x128xf32>
    %22 = vector.shape_cast %21 : vector<1x14x14x128xf32> to vector<14x14x128xf32>
    %23 = vector.broadcast %20 : f32 to vector<14x14x128xf32>
    %24 = arith.mulf %23, %22 : vector<14x14x128xf32>
    %25 = arith.addf %19, %24 : vector<14x14x128xf32>
    %c3_15 = arith.constant 3 : index
    %26 = memref.load %arg1[%c3_15] : memref<10xf32, #tpu.memory_space<smem>>
    %c1_16 = arith.constant 1 : index
    %c1_17 = arith.constant 1 : index
    %c0_18 = arith.constant 0 : index
    %c0_19 = arith.constant 0 : index
    %27 = vector.load %arg2[%c1_16, %c1_17, %c0_18, %c0_19] : memref<4x16x16x128xf32, #tpu.memory_space<vmem>>, vector<1x14x14x128xf32>
    %28 = vector.shape_cast %27 : vector<1x14x14x128xf32> to vector<14x14x128xf32>
    %29 = vector.broadcast %26 : f32 to vector<14x14x128xf32>
    %30 = arith.mulf %29, %28 : vector<14x14x128xf32>
    %31 = arith.addf %25, %30 : vector<14x14x128xf32>
    %c5 = arith.constant 5 : index
    %32 = memref.load %arg1[%c5] : memref<10xf32, #tpu.memory_space<smem>>
    %c1_20 = arith.constant 1 : index
    %c1_21 = arith.constant 1 : index
    %c1_22 = arith.constant 1 : index
    %c0_23 = arith.constant 0 : index
    %33 = vector.load %arg2[%c1_20, %c1_21, %c1_22, %c0_23] : memref<4x16x16x128xf32, #tpu.memory_space<vmem>>, vector<1x14x14x128xf32>
    %34 = vector.shape_cast %33 : vector<1x14x14x128xf32> to vector<14x14x128xf32>
    %35 = vector.broadcast %32 : f32 to vector<14x14x128xf32>
    %36 = arith.mulf %35, %34 : vector<14x14x128xf32>
    %37 = arith.addf %31, %36 : vector<14x14x128xf32>
    %c6 = arith.constant 6 : index
    %38 = memref.load %arg1[%c6] : memref<10xf32, #tpu.memory_space<smem>>
    %c3_24 = arith.constant 3 : index
    %c1_25 = arith.constant 1 : index
    %c0_26 = arith.constant 0 : index
    %c0_27 = arith.constant 0 : index
    %39 = vector.load %arg2[%c3_24, %c1_25, %c0_26, %c0_27] : memref<4x16x16x128xf32, #tpu.memory_space<vmem>>, vector<1x14x14x128xf32>
    %40 = vector.shape_cast %39 : vector<1x14x14x128xf32> to vector<14x14x128xf32>
    %41 = vector.broadcast %38 : f32 to vector<14x14x128xf32>
    %42 = arith.mulf %41, %40 : vector<14x14x128xf32>
    %43 = arith.addf %37, %42 : vector<14x14x128xf32>
    %c7 = arith.constant 7 : index
    %44 = memref.load %arg1[%c7] : memref<10xf32, #tpu.memory_space<smem>>
    %c2_28 = arith.constant 2 : index
    %c1_29 = arith.constant 1 : index
    %c1_30 = arith.constant 1 : index
    %c0_31 = arith.constant 0 : index
    %45 = vector.load %arg2[%c2_28, %c1_29, %c1_30, %c0_31] : memref<4x16x16x128xf32, #tpu.memory_space<vmem>>, vector<1x14x14x128xf32>
    %46 = vector.shape_cast %45 : vector<1x14x14x128xf32> to vector<14x14x128xf32>
    %47 = vector.broadcast %44 : f32 to vector<14x14x128xf32>
    %48 = arith.mulf %47, %46 : vector<14x14x128xf32>
    %49 = arith.addf %43, %48 : vector<14x14x128xf32>
    %c8 = arith.constant 8 : index
    %50 = memref.load %arg1[%c8] : memref<10xf32, #tpu.memory_space<smem>>
    %c3_32 = arith.constant 3 : index
    %c1_33 = arith.constant 1 : index
    %c1_34 = arith.constant 1 : index
    %c0_35 = arith.constant 0 : index
    %51 = vector.load %arg2[%c3_32, %c1_33, %c1_34, %c0_35] : memref<4x16x16x128xf32, #tpu.memory_space<vmem>>, vector<1x14x14x128xf32>
    %52 = vector.shape_cast %51 : vector<1x14x14x128xf32> to vector<14x14x128xf32>
    %53 = vector.broadcast %50 : f32 to vector<14x14x128xf32>
    %54 = arith.mulf %53, %52 : vector<14x14x128xf32>
    %55 = arith.addf %49, %54 : vector<14x14x128xf32>
    %cst = arith.constant -2.560000e+02 : f32
    %56 = vector.broadcast %cst : f32 to vector<14x14x128xf32>
    %57 = arith.maximumf %55, %56 : vector<14x14x128xf32>
    %cst_36 = arith.constant 2.560000e+02 : f32
    %58 = vector.broadcast %cst_36 : f32 to vector<14x14x128xf32>
    %59 = arith.minimumf %57, %58 : vector<14x14x128xf32>
    %c0_37 = arith.constant 0 : index
    %c0_38 = arith.constant 0 : index
    %c0_39 = arith.constant 0 : index
    %60 = vector.load %arg3[%c0_37, %c0_38, %c0_39] : memref<14x14x128xf32, #tpu.memory_space<vmem>>, vector<14x14x128xf32>
    tpu.vector_store %arg3[%c0_37, %c0_38, %c0_39], %59 {strides = array<i32>} : memref<14x14x128xf32, #tpu.memory_space<vmem>>, vector<14x14x128xf32>,
    return
  }
  func.func @transform_0(%arg0: i32) -> i32 {
    %c0_i32 = arith.constant 0 : i32
    %c0_i32_0 = arith.constant 0 : i32
    return %c0_i32 : i32
  }
  func.func @transform_1(%arg0: i32) -> (i32, i32, i32, i32) {
    %c0_i32 = arith.constant 0 : i32
    %c0_i32_0 = arith.constant 0 : i32
    %c0_i32_1 = arith.constant 0 : i32
    %c0_i32_2 = arith.constant 0 : i32
    return %c0_i32, %c0_i32_0, %c0_i32_1, %arg0 : i32, i32, i32, i32
  }
  func.func @transform_2(%arg0: i32) -> (i32, i32, i32) {
    %c0_i32 = arith.constant 0 : i32
    %c0_i32_0 = arith.constant 0 : i32
    %c0_i32_1 = arith.constant 0 : i32
    return %c0_i32, %c0_i32_0, %arg0 : i32, i32, i32
  }
}

</mosaic_0001>

<bundles_post_ra>
// kernel: model_forward.1
= control target key start
LH: loop header
LB: loop body
LE: loop exit
PB: predicated region body
PF: predicated region fallthrough
CT: control target
= control target key end

     0   :  { %7 = vsyncpa [#allocation3], 0  ;;  %s2253_s0 = inlined_call_operand.vmem [shape: f32[10], index: 0, kind: input, shape index: {}]   ;;  %s2254_s1 = inlined_call_operand.vmem [shape: f32[4,16,16,128], index: 1, kind: input, shape index: {}]   ;;  %s2255_s2 = inlined_call_operand.vmem [shape: f32[14,14,128], index: 2, kind: output, shape index: {}]  }
   0x1   :  { %s14_s11 = sshll.u32 %s2253_s0, 4  ;;  %s15_s11 = int_to_ptr.vmem [resolvable:$true] %s14_s11 }
   0x2   :  { %s1185_s12 = scalar_lea.vmem %s15_s11, 16  ;;  %p1190_p1 = scmp.lt.s32.totalorder %s15_s11, %s15_s11 }
   0x3   :  { %p1186_p0 = scmp.ne.s32.totalorder %s15_s11, %s1185_s12  ;;  %p1191_p2 = scmp.lt.s32.totalorder %s1185_s12, %s1185_s12 }
   0x5   :  { %p1192_p3 = por %p1191_p2, %p1190_p1 }
   0x7   :  { %p1193_p4 = pnand %p1192_p3, %p1186_p0 }
   0x9   :  { %1196 = shalt.err (!%p1193_p4)
}
   0xa   :  { %s1199_s13 = smov [#allocation2]  }
   0xb   :  { %17 = dma.vmem_to_smem %s15_s11, 16, %s1199_s13, [#allocation3]  }
   0xc   :  { %1197 = dma.done.wait [#allocation3], 16  }
   0xd   :  { %1198 = vsyncadd [#allocation3], 4294967280 }
   0xe   :  { %23 = sfence }
   0xf   :  { %s895_s14 = sld [smem:[#allocation2 + $0x9]]  ;;  %v897_v0 = vld [vmem:[%s2254_s1 + $0x11] sm:$0xff]  ;;  %v898_v1 = vld [vmem:[%s2254_s1 + $0x19] sm:$0x3f]  ;;  %v925_v2 = vld [vmem:[%s2254_s1 + $0x300] sm:$0xff] }
  0x10   :  { %s896_s15 = sld [smem:[#allocation2 + $0x4]]  ;;  %v926_v3 = vld [vmem:[%s2254_s1 + $0x308] sm:$0x3f]  ;;  %v1012_v19 = vld [vmem:[%s2254_s1 + $0x110] sm:$0xff]  ;;  %v1013_v24 = vld [vmem:[%s2254_s1 + $0x118] sm:$0x3f] }
  0x11   :  { %s113_s16 = sld [smem:[#allocation2]]  ;;  %v954_v6 = vld [vmem:[%s2254_s1 + $0x201] sm:$0xff]  ;;  %v955_v10 = vld [vmem:[%s2254_s1 + $0x209] sm:$0x3f]  ;;  %v1070_v27 = vld [vmem:[%s2254_s1 + $0x310] sm:$0xff] }
  0x12   :  { %s953_s17 = sld [smem:[#allocation2 + $0x1]]  ;;  %v983_v13 = vld [vmem:[%s2254_s1 + $0x301] sm:$0xff]  ;;  %v984_v15 = vld [vmem:[%s2254_s1 + $0x309] sm:$0x3f]  ;;  %v1041_v31 = vld [vmem:[%s2254_s1 + $0x111] sm:$0xff] }
  0x13   :  { %s982_s18 = sld [smem:[#allocation2 + $0x2]]  ;;  %v899_v21 = vld [vmem:[%s2254_s1 + $0x21] sm:$0xff]  ;;  %v1042_v33 = vld [vmem:[%s2254_s1 + $0x119] sm:$0x3f]  ;;  %v1099_v37 = vld [vmem:[%s2254_s1 + $0x211] sm:$0xff] }
  0x14   :  { %s1011_s20 = sld [smem:[#allocation2 + $0x3]]  ;;  %v1071_v41 = vld [vmem:[%s2254_s1 + $0x318] sm:$0x3f]  ;;  %v900_v49 = vld [vmem:[%s2254_s1 + $0x29] sm:$0x3f]  ;;  %v1014_v59 = vld [vmem:[%s2254_s1 + $0x120] sm:$0xff] }
  0x15   :  { %s1227_s25 = sld [smem:[#allocation2 + $0x5]]  ;;  %v1234_v5 = vstv %s895_s14  ;;  %v1128_v45 = vld [vmem:[%s2254_s1 + $0x311] sm:$0xff]  ;;  %v1100_v48 = vld [vmem:[%s2254_s1 + $0x219] sm:$0x3f] }
  0x16   :  { %v1232_v4 = vstv %s896_s15  ;;  %s1239_s30 = sld [smem:[#allocation2 + $0x6]]  ;;  %v928_v54 = vld [vmem:[%s2254_s1 + $0x318] sm:$0x3f] }
  0x17   :  { %v56_v7 = vmul.f32 %v897_v0, %v1232_v4  ;;  %v1242_v8 = vstv %s113_s16  ;;  %s1244_s3 = sld [smem:[#allocation2 + $0x7]]  ;;  %v57_v9 = vmul.f32 %v898_v1, %v1232_v4  ;;  %v58_v34 = vmul.f32 %v899_v21, %v1232_v4  ;;  %v957_v60 = vld [vmem:[%s2254_s1 + $0x219] sm:$0x3f]  ;;  %v1043_v1 = vld [vmem:[%s2254_s1 + $0x121] sm:$0xff] }
  0x18   :  { %v144_v11 = vmul.f32 %v925_v2, %v1242_v8  ;;  %v1251_v12 = vstv %s953_s17  ;;  %s1256_s8 = sld [smem:[#allocation2 + $0x8]]  ;;  %v145_v14 = vmul.f32 %v926_v3, %v1242_v8  ;;  %v146_v42 = vmul.f32 %v1070_v27, %v1242_v8  ;;  %v1129_v62 = vld [vmem:[%s2254_s1 + $0x319] sm:$0x3f] }
  0x19   :  { %v85_v16 = vadd.f32 %v1234_v5, %v56_v7  ;;  %v231_v17 = vmul.f32 %v954_v6, %v1251_v12  ;;  %v1264_v18 = vstv %s982_s18  ;;  %v86_v20 = vadd.f32 %v1234_v5, %v57_v9 }
  0x1a   :  { %v1273_v22 = vstv %s1011_s20  ;;  %v232_v23 = vmul.f32 %v955_v10, %v1251_v12  ;;  %v317_v26 = vmul.f32 %v983_v13, %v1264_v18  ;;  %v318_v29 = vmul.f32 %v984_v15, %v1264_v18  ;;  %v986_v10 = vld [vmem:[%s2254_s1 + $0x319] sm:$0x3f] }
  0x1b   :  { %v172_v25 = vadd.f32 %v144_v11, %v85_v16  ;;  %v173_v28 = vadd.f32 %v145_v14, %v86_v20  ;;  %v404_v30 = vmul.f32 %v1012_v19, %v1273_v22  ;;  %v1289_v32 = vstv %s1227_s25  ;;  %v1072_v14 = vld [vmem:[%s2254_s1 + $0x320] sm:$0xff] }
  0x1c   :  { %v1296_v36 = vstv %s1239_s30  ;;  %v405_v39 = vmul.f32 %v1013_v24, %v1273_v22  ;;  %v490_v44 = vmul.f32 %v1041_v31, %v1289_v32  ;;  %v491_v47 = vmul.f32 %v1042_v33, %v1289_v32  ;;  %v1015_v24 = vld [vmem:[%s2254_s1 + $0x128] sm:$0x3f] }
  0x1d   :  { %v259_v35 = vadd.f32 %v231_v17, %v172_v25  ;;  %v260_v38 = vadd.f32 %v232_v23, %v173_v28  ;;  %v1303_v40 = vstv %s1244_s3  ;;  %v577_v50 = vmul.f32 %v1070_v27, %v1296_v36  ;;  %v901_v17 = vld [vmem:[%s2254_s1 + $0x31] sm:$0xff]  ;;  %v1101_v27 = vld [vmem:[%s2254_s1 + $0x221] sm:$0xff]  ;;  %v1044_v33 = vld [vmem:[%s2254_s1 + $0x129] sm:$0x3f] }
  0x1e   :  { %v1322_v51 = vstv %s1256_s8  ;;  %v87_v52 = vadd.f32 %v1234_v5, %v58_v34  ;;  %v233_v53 = vmul.f32 %v1099_v37, %v1251_v12  ;;  %v664_v56 = vmul.f32 %v1099_v37, %v1303_v40 }
  0x1f   :  { %v345_v43 = vadd.f32 %v317_v26, %v259_v35  ;;  %v346_v46 = vadd.f32 %v318_v29, %v260_v38  ;;  %v578_v58 = vmul.f32 %v1071_v41, %v1296_v36  ;;  %v665_v61 = vmul.f32 %v1100_v48, %v1303_v40  ;;  %v902_v48 = vld [vmem:[%s2254_s1 + $0x39] sm:$0x3f] }
  0x20   :  { %v174_v63 = vadd.f32 %v146_v42, %v87_v52  ;;  %v319_v0 = vmul.f32 %v1128_v45, %v1264_v18  ;;  %v59_v2 = vmul.f32 %v900_v49, %v1232_v4  ;;  %v750_v6 = vmul.f32 %v1128_v45, %v1322_v51  ;;  %v1073_v45 = vld [vmem:[%s2254_s1 + $0x328] sm:$0x3f] }
  0x21   :  { %v432_v55 = vadd.f32 %v404_v30, %v345_v43  ;;  %v433_v57 = vadd.f32 %v405_v39, %v346_v46  ;;  %v147_v9 = vmul.f32 %v928_v54, %v1242_v8  ;;  %v406_v13 = vmul.f32 %v1014_v59, %v1273_v22  ;;  %v1130_v39 = vld [vmem:[%s2254_s1 + $0x321] sm:$0xff]  ;;  %v1102_v54 = vld [vmem:[%s2254_s1 + $0x229] sm:$0x3f] }
  0x22   :  { %v261_v11 = vadd.f32 %v233_v53, %v174_v63  ;;  %v88_v15 = vadd.f32 %v1234_v5, %v59_v2  ;;  %v234_v16 = vmul.f32 %v957_v60, %v1251_v12  ;;  %v751_v21 = vmul.f32 %v1129_v62, %v1322_v51  ;;  %v1045_v2 = vld [vmem:[%s2254_s1 + $0x131] sm:$0xff] }
  0x23   :  { %v518_v3 = vadd.f32 %v490_v44, %v432_v55  ;;  %v519_v7 = vadd.f32 %v491_v47, %v433_v57  ;;  %v492_v23 = vmul.f32 %v1043_v1, %v1289_v32  ;;  %v579_v26 = vmul.f32 %v1072_v14, %v1296_v36  ;;  %v1016_v55 = vld [vmem:[%s2254_s1 + $0x130] sm:$0xff]  ;;  %v1131_v1 = vld [vmem:[%s2254_s1 + $0x329] sm:$0x3f] }
  0x24   :  { %v347_v25 = vadd.f32 %v319_v0, %v261_v11  ;;  %v175_v28 = vadd.f32 %v147_v9, %v88_v15  ;;  %v320_v29 = vmul.f32 %v986_v10, %v1264_v18  ;;  %v60_v34 = vmul.f32 %v901_v17, %v1232_v4  ;;  %v988_v11 = vld [vmem:[%s2254_s1 + $0x329] sm:$0x3f]  ;;  %v1074_v15 = vld [vmem:[%s2254_s1 + $0x330] sm:$0xff] }
  0x25   :  { %v605_v19 = vadd.f32 %v577_v50, %v518_v3  ;;  %v606_v20 = vadd.f32 %v578_v58, %v519_v7  ;;  %v148_v35 = vmul.f32 %v1072_v14, %v1242_v8  ;;  %v666_v38 = vmul.f32 %v1101_v27, %v1303_v40 }
  0x26   :  { %v434_v37 = vadd.f32 %v406_v13, %v347_v25  ;;  %v262_v41 = vadd.f32 %v234_v16, %v175_v28  ;;  %v407_v42 = vmul.f32 %v1015_v24, %v1273_v22  ;;  %v89_v46 = vadd.f32 %v1234_v5, %v60_v34  ;;  %v1017_v25 = vld [vmem:[%s2254_s1 + $0x138] sm:$0x3f] }
  0x27   :  { %v692_v30 = vadd.f32 %v664_v56, %v605_v19  ;;  %v693_v31 = vadd.f32 %v665_v61, %v606_v20  ;;  %v235_v47 = vmul.f32 %v1101_v27, %v1251_v12  ;;  %v752_v50 = vmul.f32 %v1130_v39, %v1322_v51  ;;  %v930_v56 = vld [vmem:[%s2254_s1 + $0x328] sm:$0x3f]  ;;  %v1103_v28 = vld [vmem:[%s2254_s1 + $0x231] sm:$0xff]  ;;  %v1046_v34 = vld [vmem:[%s2254_s1 + $0x139] sm:$0x3f] }
  0x28   :  { %v520_v49 = vadd.f32 %v492_v23, %v434_v37  ;;  %v348_v52 = vadd.f32 %v320_v29, %v262_v41  ;;  %v493_v53 = vmul.f32 %v1044_v33, %v1289_v32  ;;  %v176_v59 = vadd.f32 %v148_v35, %v89_v46  ;;  %v959_v61 = vld [vmem:[%s2254_s1 + $0x229] sm:$0x3f]  ;;  %v903_v19 = vld [vmem:[%s2254_s1 + $0x41] sm:$0xff]  ;;  %v1075_v35 = vld [vmem:[%s2254_s1 + $0x338] sm:$0x3f] }
  0x29   :  { %v778_v43 = vadd.f32 %v750_v6, %v692_v30  ;;  %v779_v44 = vadd.f32 %v751_v21, %v693_v31  ;;  %v321_v60 = vmul.f32 %v1130_v39, %v1264_v18  ;;  %v580_v0 = vmul.f32 %v1073_v45, %v1296_v36  ;;  %v904_v45 = vld [vmem:[%s2254_s1 + $0x49] sm:$0x3f] }
  0x2a   :  { %v607_v62 = vadd.f32 %v579_v26, %v520_v49  ;;  %v435_v63 = vadd.f32 %v407_v42, %v348_v52  ;;  %v61_v3 = vmul.f32 %v902_v48, %v1232_v4  ;;  %v667_v6 = vmul.f32 %v1102_v54, %v1303_v40  ;;  %v1132_v42 = vld [vmem:[%s2254_s1 + $0x331] sm:$0xff] }
  0x2b   :  { %v1156_v57 = vclamps-f32 %v778_v43, 256.0  ;;  %v1157_v58 = vclamps-f32 %v779_v44, 256.0  ;;  %v263_v7 = vadd.f32 %v235_v47, %v176_v59  ;;  %v408_v9 = vmul.f32 %v1016_v55, %v1273_v22  ;;  %v932_v52 = vld [vmem:[%s2254_s1 + $0x338] sm:$0x3f] }
  0x2c   :  { %v149_v10 = vmul.f32 %v930_v56, %v1242_v8  ;;  %v694_v13 = vadd.f32 %v666_v38, %v607_v62  ;;  %v521_v14 = vadd.f32 %v493_v53, %v435_v63  ;;  %v90_v16 = vadd.f32 %v1234_v5, %v61_v3  ;;  %v1104_v59 = vld [vmem:[%s2254_s1 + $0x239] sm:$0x3f]  ;;  %v1047_v63 = vld [vmem:[%s2254_s1 + $0x141] sm:$0xff] }
  0x2d   :  { %862 = vst [vmem:[%s2255_s2] sm:$0xff] %v1156_v57  ;;  %863 = vst [vmem:[%s2255_s2 + $0x8] sm:$0x3f] %v1157_v58  ;;  %v236_v17 = vmul.f32 %v959_v61, %v1251_v12  ;;  %v753_v20 = vmul.f32 %v1131_v1, %v1322_v51  ;;  %v349_v21 = vadd.f32 %v321_v60, %v263_v7  ;;  %v961_v57 = vld [vmem:[%s2254_s1 + $0x239] sm:$0x3f] }
  0x2e   :  { %v494_v23 = vmul.f32 %v1045_v2, %v1289_v32  ;;  %v581_v24 = vmul.f32 %v1074_v15, %v1296_v36  ;;  %v780_v26 = vadd.f32 %v752_v50, %v694_v13  ;;  %v608_v27 = vadd.f32 %v580_v0, %v521_v14  ;;  %v1018_v50 = vld [vmem:[%s2254_s1 + $0x140] sm:$0xff]  ;;  %v1133_v60 = vld [vmem:[%s2254_s1 + $0x339] sm:$0x3f] }
  0x2f   :  { %v177_v29 = vadd.f32 %v149_v10, %v90_v16  ;;  %v322_v30 = vmul.f32 %v988_v11, %v1264_v18  ;;  %v436_v31 = vadd.f32 %v408_v9, %v349_v21  ;;  %v668_v33 = vmul.f32 %v1103_v28, %v1303_v40  ;;  %v990_v7 = vld [vmem:[%s2254_s1 + $0x339] sm:$0x3f]  ;;  %v1076_v11 = vld [vmem:[%s2254_s1 + $0x340] sm:$0xff]  ;;  %v1019_v21 = vld [vmem:[%s2254_s1 + $0x148] sm:$0x3f] }
  0x30   :  { %v62_v37 = vmul.f32 %v903_v19, %v1232_v4  ;;  %v150_v38 = vmul.f32 %v1074_v15, %v1242_v8  ;;  %v1158_v39 = vclamps-f32 %v780_v26, 256.0  ;;  %v695_v41 = vadd.f32 %v667_v6, %v608_v27  ;;  %v905_v15 = vld [vmem:[%s2254_s1 + $0x51] sm:$0xff] }
  0x31   :  { %v264_v43 = vadd.f32 %v236_v17, %v177_v29  ;;  %v409_v44 = vmul.f32 %v1017_v25, %v1273_v22  ;;  %v522_v46 = vadd.f32 %v494_v23, %v436_v31  ;;  %v754_v47 = vmul.f32 %v1132_v42, %v1322_v51  ;;  %v1105_v25 = vld [vmem:[%s2254_s1 + $0x241] sm:$0xff] }
  0x32   :  { %v91_v48 = vadd.f32 %v1234_v5, %v62_v37  ;;  %v237_v49 = vmul.f32 %v1103_v28, %v1251_v12  ;;  %864 = vst [vmem:[%s2255_s2 + $0x10] sm:$0xff] %v1158_v39  ;;  %v781_v53 = vadd.f32 %v753_v20, %v695_v41  ;;  %v495_v55 = vmul.f32 %v1046_v34, %v1289_v32  ;;  %v1134_v37 = vld [vmem:[%s2254_s1 + $0x341] sm:$0xff] }
  0x33   :  { %v350_v54 = vadd.f32 %v322_v30, %v264_v43  ;;  %v582_v56 = vmul.f32 %v1075_v35, %v1296_v36  ;;  %v609_v58 = vadd.f32 %v581_v24, %v522_v46  ;;  %v323_v62 = vmul.f32 %v1132_v42, %v1264_v18  ;;  %v1048_v30 = vld [vmem:[%s2254_s1 + $0x149] sm:$0x3f]  ;;  %v906_v46 = vld [vmem:[%s2254_s1 + $0x59] sm:$0x3f] }
  0x34   :  { %v178_v61 = vadd.f32 %v150_v38, %v91_v48  ;;  %v63_v0 = vmul.f32 %v904_v45, %v1232_v4  ;;  %v1159_v1 = vclamps-f32 %v781_v53, 256.0  ;;  %v410_v3 = vmul.f32 %v1018_v50, %v1273_v22  ;;  %v1077_v41 = vld [vmem:[%s2254_s1 + $0x348] sm:$0x3f] }
  0x35   :  { %v437_v2 = vadd.f32 %v409_v44, %v350_v54  ;;  %v151_v6 = vmul.f32 %v932_v52, %v1242_v8  ;;  %v696_v9 = vadd.f32 %v668_v33, %v609_v58  ;;  %v238_v14 = vmul.f32 %v961_v57, %v1251_v12  ;;  %v1106_v53 = vld [vmem:[%s2254_s1 + $0x249] sm:$0x3f]  ;;  %v1020_v54 = vld [vmem:[%s2254_s1 + $0x150] sm:$0xff] }
  0x36   :  { %v265_v10 = vadd.f32 %v237_v49, %v178_v61  ;;  %v92_v13 = vadd.f32 %v1234_v5, %v63_v0  ;;  %865 = vst [vmem:[%s2255_s2 + $0x18] sm:$0x3f] %v1159_v1  ;;  %v669_v17 = vmul.f32 %v1104_v59, %v1303_v40  ;;  %v755_v19 = vmul.f32 %v1133_v60, %v1322_v51  ;;  %v963_v59 = vld [vmem:[%s2254_s1 + $0x249] sm:$0x3f] }
  0x37   :  { %v523_v16 = vadd.f32 %v495_v55, %v437_v2  ;;  %v496_v20 = vmul.f32 %v1047_v63, %v1289_v32  ;;  %v782_v23 = vadd.f32 %v754_v47, %v696_v9  ;;  %v324_v27 = vmul.f32 %v990_v7, %v1264_v18  ;;  %v934_v47 = vld [vmem:[%s2254_s1 + $0x348] sm:$0x3f]  ;;  %v1049_v63 = vld [vmem:[%s2254_s1 + $0x151] sm:$0xff] }
  0x38   :  { %v351_v24 = vadd.f32 %v323_v62, %v265_v10  ;;  %v179_v26 = vadd.f32 %v151_v6, %v92_v13  ;;  %v583_v29 = vmul.f32 %v1076_v11, %v1296_v36  ;;  %v64_v31 = vmul.f32 %v905_v15, %v1232_v4  ;;  %v1135_v62 = vld [vmem:[%s2254_s1 + $0x349] sm:$0x3f]  ;;  %v1078_v13 = vld [vmem:[%s2254_s1 + $0x350] sm:$0xff] }
  0x39   :  { %v610_v28 = vadd.f32 %v582_v56, %v523_v16  ;;  %v152_v33 = vmul.f32 %v1076_v11, %v1242_v8  ;;  %v1160_v34 = vclamps-f32 %v782_v23, 256.0  ;;  %v411_v39 = vmul.f32 %v1019_v21, %v1273_v22  ;;  %v992_v9 = vld [vmem:[%s2254_s1 + $0x349] sm:$0x3f]  ;;  %v907_v16 = vld [vmem:[%s2254_s1 + $0x61] sm:$0xff]  ;;  %v1021_v23 = vld [vmem:[%s2254_s1 + $0x158] sm:$0x3f] }
  0x3a   :  { %v438_v35 = vadd.f32 %v410_v3, %v351_v24  ;;  %v266_v38 = vadd.f32 %v238_v14, %v179_v26  ;;  %v670_v43 = vmul.f32 %v1105_v25, %v1303_v40  ;;  %v93_v44 = vadd.f32 %v1234_v5, %v64_v31  ;;  %v1107_v26 = vld [vmem:[%s2254_s1 + $0x251] sm:$0xff]  ;;  %v1050_v31 = vld [vmem:[%s2254_s1 + $0x159] sm:$0x3f] }
  0x3b   :  { %v697_v42 = vadd.f32 %v669_v17, %v610_v28  ;;  %v239_v45 = vmul.f32 %v1105_v25, %v1251_v12  ;;  %866 = vst [vmem:[%s2255_s2 + $0x20] sm:$0xff] %v1160_v34  ;;  %v756_v49 = vmul.f32 %v1134_v37, %v1322_v51  ;;  %v497_v52 = vmul.f32 %v1048_v30, %v1289_v32 }
  0x3c   :  { %v524_v48 = vadd.f32 %v496_v20, %v438_v35  ;;  %v352_v50 = vadd.f32 %v324_v27, %v266_v38  ;;  %v584_v56 = vmul.f32 %v1077_v41, %v1296_v36  ;;  %v180_v57 = vadd.f32 %v152_v33, %v93_v44  ;;  %v1079_v33 = vld [vmem:[%s2254_s1 + $0x358] sm:$0x3f] }
  0x3d   :  { %v783_v55 = vadd.f32 %v755_v19, %v697_v42  ;;  %v325_v58 = vmul.f32 %v1134_v37, %v1264_v18  ;;  %v65_v0 = vmul.f32 %v906_v46, %v1232_v4  ;;  %v153_v1 = vmul.f32 %v934_v47, %v1242_v8 }
  0x3e   :  { %v611_v60 = vadd.f32 %v583_v29, %v524_v48  ;;  %v439_v61 = vadd.f32 %v411_v39, %v352_v50  ;;  %v671_v3 = vmul.f32 %v1106_v53, %v1303_v40  ;;  %v267_v6 = vadd.f32 %v239_v45, %v180_v57  ;;  %v1136_v39 = vld [vmem:[%s2254_s1 + $0x351] sm:$0xff]  ;;  %v1022_v48 = vld [vmem:[%s2254_s1 + $0x160] sm:$0xff]  ;;  %v1108_v57 = vld [vmem:[%s2254_s1 + $0x259] sm:$0x3f] }
  0x3f   :  { %v1161_v2 = vclamps-f32 %v783_v55, 256.0  ;;  %v412_v7 = vmul.f32 %v1020_v54, %v1273_v22  ;;  %v94_v14 = vadd.f32 %v1234_v5, %v65_v0  ;;  %v240_v15 = vmul.f32 %v963_v59, %v1251_v12  ;;  %v965_v55 = vld [vmem:[%s2254_s1 + $0x259] sm:$0x3f] }
  0x40   :  { %v698_v10 = vadd.f32 %v670_v43, %v611_v60  ;;  %v525_v11 = vadd.f32 %v497_v52, %v439_v61  ;;  %v757_v17 = vmul.f32 %v1135_v62, %v1322_v51  ;;  %v353_v19 = vadd.f32 %v325_v58, %v267_v6  ;;  %v908_v43 = vld [vmem:[%s2254_s1 + $0x69] sm:$0x3f]  ;;  %v1137_v58 = vld [vmem:[%s2254_s1 + $0x359] sm:$0x3f]  ;;  %v1051_v61 = vld [vmem:[%s2254_s1 + $0x161] sm:$0xff] }
  0x41   :  { %867 = vst [vmem:[%s2255_s2 + $0x28] sm:$0x3f] %v1161_v2  ;;  %v498_v20 = vmul.f32 %v1049_v63, %v1289_v32  ;;  %v585_v21 = vmul.f32 %v1078_v13, %v1296_v36  ;;  %v181_v27 = vadd.f32 %v153_v1, %v94_v14  ;;  %v326_v28 = vmul.f32 %v992_v9, %v1264_v18  ;;  %v1080_v9 = vld [vmem:[%s2254_s1 + $0x360] sm:$0xff] }
  0x42   :  { %v784_v24 = vadd.f32 %v756_v49, %v698_v10  ;;  %v612_v25 = vadd.f32 %v584_v56, %v525_v11  ;;  %v440_v29 = vadd.f32 %v412_v7, %v353_v19  ;;  %v672_v30 = vmul.f32 %v1107_v26, %v1303_v40  ;;  %v936_v49 = vld [vmem:[%s2254_s1 + $0x358] sm:$0x3f]  ;;  %v1023_v19 = vld [vmem:[%s2254_s1 + $0x168] sm:$0x3f] }
  0x43   :  { %v66_v34 = vmul.f32 %v907_v16, %v1232_v4  ;;  %v154_v35 = vmul.f32 %v1078_v13, %v1242_v8  ;;  %v268_v41 = vadd.f32 %v240_v15, %v181_v27  ;;  %v413_v42 = vmul.f32 %v1021_v23, %v1273_v22  ;;  %v909_v13 = vld [vmem:[%s2254_s1 + $0x71] sm:$0xff]  ;;  %v1109_v23 = vld [vmem:[%s2254_s1 + $0x261] sm:$0xff] }
  0x44   :  { %v1162_v37 = vclamps-f32 %v784_v24, 256.0  ;;  %v699_v38 = vadd.f32 %v671_v3, %v612_v25  ;;  %v526_v44 = vadd.f32 %v498_v20, %v440_v29  ;;  %v758_v45 = vmul.f32 %v1136_v39, %v1322_v51  ;;  %v994_v3 = vld [vmem:[%s2254_s1 + $0x359] sm:$0x3f] }
  0x45   :  { %v95_v46 = vadd.f32 %v1234_v5, %v66_v34  ;;  %v241_v47 = vmul.f32 %v1107_v26, %v1251_v12  ;;  %v354_v52 = vadd.f32 %v326_v28, %v268_v41  ;;  %v499_v53 = vmul.f32 %v1050_v31, %v1289_v32  ;;  %v1052_v28 = vld [vmem:[%s2254_s1 + $0x169] sm:$0x3f]  ;;  %v1138_v34 = vld [vmem:[%s2254_s1 + $0x361] sm:$0xff] }
  0x46   :  { %868 = vst [vmem:[%s2255_s2 + $0x30] sm:$0xff] %v1162_v37  ;;  %v785_v50 = vadd.f32 %v757_v17, %v699_v38  ;;  %v586_v54 = vmul.f32 %v1079_v33, %v1296_v36  ;;  %v613_v56 = vadd.f32 %v585_v21, %v526_v44  ;;  %v327_v60 = vmul.f32 %v1136_v39, %v1264_v18  ;;  %v1081_v38 = vld [vmem:[%s2254_s1 + $0x368] sm:$0x3f]  ;;  %v910_v44 = vld [vmem:[%s2254_s1 + $0x79] sm:$0x3f] }
  0x47   :  { %v182_v59 = vadd.f32 %v154_v35, %v95_v46  ;;  %v67_v62 = vmul.f32 %v908_v43, %v1232_v4  ;;  %v441_v0 = vadd.f32 %v413_v42, %v354_v52  ;;  %v414_v1 = vmul.f32 %v1022_v48, %v1273_v22  ;;  %v1024_v52 = vld [vmem:[%s2254_s1 + $0x170] sm:$0xff] }
  0x48   :  { %v1163_v63 = vclamps-f32 %v785_v50, 256.0  ;;  %v155_v2 = vmul.f32 %v936_v49, %v1242_v8  ;;  %v700_v6 = vadd.f32 %v672_v30, %v613_v56  ;;  %v242_v11 = vmul.f32 %v965_v55, %v1251_v12  ;;  %v1110_v50 = vld [vmem:[%s2254_s1 + $0x269] sm:$0x3f] }
  0x49   :  { %v269_v7 = vadd.f32 %v241_v47, %v182_v59  ;;  %v96_v10 = vadd.f32 %v1234_v5, %v67_v62  ;;  %v527_v14 = vadd.f32 %v499_v53, %v441_v0  ;;  %v673_v15 = vmul.f32 %v1108_v57, %v1303_v40  ;;  %v967_v57 = vld [vmem:[%s2254_s1 + $0x269] sm:$0x3f] }
  0x4a   :  { %869 = vst [vmem:[%s2255_s2 + $0x38] sm:$0x3f] %v1163_v63  ;;  %v759_v16 = vmul.f32 %v1137_v58, %v1322_v51  ;;  %v500_v17 = vmul.f32 %v1051_v61, %v1289_v32  ;;  %v786_v20 = vadd.f32 %v758_v45, %v700_v6  ;;  %v328_v25 = vmul.f32 %v994_v3, %v1264_v18  ;;  %v938_v45 = vld [vmem:[%s2254_s1 + $0x368] sm:$0x3f]  ;;  %v1053_v61 = vld [vmem:[%s2254_s1 + $0x171] sm:$0xff] }
  0x4b   :  { %v355_v21 = vadd.f32 %v327_v60, %v269_v7  ;;  %v183_v24 = vadd.f32 %v155_v2, %v96_v10  ;;  %v614_v26 = vadd.f32 %v586_v54, %v527_v14  ;;  %v587_v27 = vmul.f32 %v1080_v9, %v1296_v36  ;;  %v1139_v60 = vld [vmem:[%s2254_s1 + $0x369] sm:$0x3f]  ;;  %v1082_v10 = vld [vmem:[%s2254_s1 + $0x370] sm:$0xff]  ;;  %v911_v14 = vld [vmem:[%s2254_s1 + $0x81] sm:$0xff] }
  0x4c   :  { %v68_v29 = vmul.f32 %v909_v13, %v1232_v4  ;;  %v156_v30 = vmul.f32 %v1080_v9, %v1242_v8  ;;  %v1164_v31 = vclamps-f32 %v786_v20, 256.0  ;;  %v415_v37 = vmul.f32 %v1023_v19, %v1273_v22  ;;  %v996_v6 = vld [vmem:[%s2254_s1 + $0x369] sm:$0x3f]  ;;  %v1025_v20 = vld [vmem:[%s2254_s1 + $0x178] sm:$0x3f] }
  0x4d   :  { %v442_v33 = vadd.f32 %v414_v1, %v355_v21  ;;  %v270_v35 = vadd.f32 %v242_v11, %v183_v24  ;;  %v701_v39 = vadd.f32 %v673_v15, %v614_v26  ;;  %v674_v41 = vmul.f32 %v1109_v23, %v1303_v40  ;;  %v1111_v24 = vld [vmem:[%s2254_s1 + $0x271] sm:$0xff] }
  0x4e   :  { %v97_v42 = vadd.f32 %v1234_v5, %v68_v29  ;;  %v243_v43 = vmul.f32 %v1109_v23, %v1251_v12  ;;  %870 = vst [vmem:[%s2255_s2 + $0x40] sm:$0xff] %v1164_v31  ;;  %v760_v47 = vmul.f32 %v1138_v34, %v1322_v51  ;;  %v501_v49 = vmul.f32 %v1052_v28, %v1289_v32  ;;  %v1054_v29 = vld [vmem:[%s2254_s1 + $0x179] sm:$0x3f] }
  0x4f   :  { %v528_v46 = vadd.f32 %v500_v17, %v442_v33  ;;  %v356_v48 = vadd.f32 %v328_v25, %v270_v35  ;;  %v787_v53 = vadd.f32 %v759_v16, %v701_v39  ;;  %v588_v54 = vmul.f32 %v1081_v38, %v1296_v36 }
  0x50   :  { %v184_v55 = vadd.f32 %v156_v30, %v97_v42  ;;  %v329_v56 = vmul.f32 %v1138_v34, %v1264_v18  ;;  %v69_v62 = vmul.f32 %v910_v44, %v1232_v4  ;;  %v157_v63 = vmul.f32 %v938_v45, %v1242_v8  ;;  %v1083_v30 = vld [vmem:[%s2254_s1 + $0x378] sm:$0x3f] }
  0x51   :  { %v615_v58 = vadd.f32 %v587_v27, %v528_v46  ;;  %v443_v59 = vadd.f32 %v415_v37, %v356_v48  ;;  %v1165_v0 = vclamps-f32 %v787_v53, 256.0  ;;  %v675_v1 = vmul.f32 %v1110_v50, %v1303_v40  ;;  %v1140_v37 = vld [vmem:[%s2254_s1 + $0x371] sm:$0xff]  ;;  %v1026_v46 = vld [vmem:[%s2254_s1 + $0x180] sm:$0xff]  ;;  %v969_v53 = vld [vmem:[%s2254_s1 + $0x279] sm:$0x3f] }
  0x52   :  { %v271_v2 = vadd.f32 %v243_v43, %v184_v55  ;;  %v416_v3 = vmul.f32 %v1024_v52, %v1273_v22  ;;  %v98_v11 = vadd.f32 %v1234_v5, %v69_v62  ;;  %v244_v13 = vmul.f32 %v967_v57, %v1251_v12  ;;  %v1112_v55 = vld [vmem:[%s2254_s1 + $0x279] sm:$0x3f] }
  0x53   :  { %v702_v7 = vadd.f32 %v674_v41, %v615_v58  ;;  %v529_v9 = vadd.f32 %v501_v49, %v443_v59  ;;  %871 = vst [vmem:[%s2255_s2 + $0x48] sm:$0x3f] %v1165_v0  ;;  %v761_v15 = vmul.f32 %v1139_v60, %v1322_v51  ;;  %v502_v17 = vmul.f32 %v1053_v61, %v1289_v32  ;;  %v912_v41 = vld [vmem:[%s2254_s1 + $0x89] sm:$0x3f]  ;;  %v1055_v59 = vld [vmem:[%s2254_s1 + $0x181] sm:$0xff] }
  0x54   :  { %v357_v16 = vadd.f32 %v329_v56, %v271_v2  ;;  %v589_v19 = vmul.f32 %v1082_v10, %v1296_v36  ;;  %v185_v25 = vadd.f32 %v157_v63, %v98_v11  ;;  %v330_v26 = vmul.f32 %v996_v6, %v1264_v18  ;;  %v1141_v56 = vld [vmem:[%s2254_s1 + $0x379] sm:$0x3f]  ;;  %v1084_v6 = vld [vmem:[%s2254_s1 + $0x380] sm:$0xff] }
  0x55   :  { %v788_v21 = vadd.f32 %v760_v47, %v702_v7  ;;  %v616_v23 = vadd.f32 %v588_v54, %v529_v9  ;;  %v676_v28 = vmul.f32 %v1111_v24, %v1303_v40  ;;  %v70_v31 = vmul.f32 %v911_v14, %v1232_v4  ;;  %v940_v47 = vld [vmem:[%s2254_s1 + $0x378] sm:$0x3f] }
  0x56   :  { %v444_v27 = vadd.f32 %v416_v3, %v357_v16  ;;  %v158_v33 = vmul.f32 %v1082_v10, %v1242_v8  ;;  %v272_v38 = vadd.f32 %v244_v13, %v185_v25  ;;  %v417_v39 = vmul.f32 %v1025_v20, %v1273_v22  ;;  %v913_v10 = vld [vmem:[%s2254_s1 + $0x91] sm:$0xff]  ;;  %v1027_v16 = vld [vmem:[%s2254_s1 + $0x188] sm:$0x3f] }
  0x57   :  { %v1166_v34 = vclamps-f32 %v788_v21, 256.0  ;;  %v703_v35 = vadd.f32 %v675_v1, %v616_v23  ;;  %v762_v43 = vmul.f32 %v1140_v37, %v1322_v51  ;;  %v99_v44 = vadd.f32 %v1234_v5, %v70_v31  ;;  %v998_v1 = vld [vmem:[%s2254_s1 + $0x379] sm:$0x3f]  ;;  %v1113_v20 = vld [vmem:[%s2254_s1 + $0x281] sm:$0xff] }
  0x58   :  { %v530_v42 = vadd.f32 %v502_v17, %v444_v27  ;;  %v245_v45 = vmul.f32 %v1111_v24, %v1251_v12  ;;  %v358_v49 = vadd.f32 %v330_v26, %v272_v38  ;;  %v503_v50 = vmul.f32 %v1054_v29, %v1289_v32  ;;  %v1056_v26 = vld [vmem:[%s2254_s1 + $0x189] sm:$0x3f]  ;;  %v1142_v31 = vld [vmem:[%s2254_s1 + $0x381] sm:$0xff] }
  0x59   :  { %872 = vst [vmem:[%s2255_s2 + $0x50] sm:$0xff] %v1166_v34  ;;  %v789_v48 = vadd.f32 %v761_v15, %v703_v35  ;;  %v590_v52 = vmul.f32 %v1083_v30, %v1296_v36  ;;  %v186_v57 = vadd.f32 %v158_v33, %v99_v44  ;;  %v331_v58 = vmul.f32 %v1140_v37, %v1264_v18  ;;  %v1085_v35 = vld [vmem:[%s2254_s1 + $0x388] sm:$0x3f] }
  0x5a   :  { %v617_v54 = vadd.f32 %v589_v19, %v530_v42  ;;  %v71_v60 = vmul.f32 %v912_v41, %v1232_v4  ;;  %v445_v62 = vadd.f32 %v417_v39, %v358_v49  ;;  %v418_v63 = vmul.f32 %v1026_v46, %v1273_v22  ;;  %v914_v42 = vld [vmem:[%s2254_s1 + $0x99] sm:$0x3f]  ;;  %v1028_v49 = vld [vmem:[%s2254_s1 + $0x190] sm:$0xff] }
  0x5b   :  { %v1167_v61 = vclamps-f32 %v789_v48, 256.0  ;;  %v159_v0 = vmul.f32 %v940_v47, %v1242_v8  ;;  %v273_v3 = vadd.f32 %v245_v45, %v186_v57  ;;  %v246_v9 = vmul.f32 %v969_v53, %v1251_v12  ;;  %v1114_v48 = vld [vmem:[%s2254_s1 + $0x289] sm:$0x3f] }
  0x5c   :  { %v704_v2 = vadd.f32 %v676_v28, %v617_v54  ;;  %v100_v7 = vadd.f32 %v1234_v5, %v71_v60  ;;  %v531_v11 = vadd.f32 %v503_v50, %v445_v62  ;;  %v677_v13 = vmul.f32 %v1112_v55, %v1303_v40  ;;  %v971_v55 = vld [vmem:[%s2254_s1 + $0x289] sm:$0x3f] }
  0x5d   :  { %873 = vst [vmem:[%s2255_s2 + $0x58] sm:$0x3f] %v1167_v61  ;;  %v763_v14 = vmul.f32 %v1141_v56, %v1322_v51  ;;  %v504_v15 = vmul.f32 %v1055_v59, %v1289_v32  ;;  %v359_v19 = vadd.f32 %v331_v58, %v273_v3  ;;  %v332_v23 = vmul.f32 %v998_v1, %v1264_v18  ;;  %v1143_v58 = vld [vmem:[%s2254_s1 + $0x389] sm:$0x3f]  ;;  %v1057_v59 = vld [vmem:[%s2254_s1 + $0x191] sm:$0xff] }
  0x5e   :  { %v790_v17 = vadd.f32 %v762_v43, %v704_v2  ;;  %v187_v21 = vadd.f32 %v159_v0, %v100_v7  ;;  %v618_v24 = vadd.f32 %v590_v52, %v531_v11  ;;  %v591_v25 = vmul.f32 %v1084_v6, %v1296_v36  ;;  %v942_v43 = vld [vmem:[%s2254_s1 + $0x388] sm:$0x3f]  ;;  %v1086_v7 = vld [vmem:[%s2254_s1 + $0x390] sm:$0xff] }
  0x5f   :  { %v72_v27 = vmul.f32 %v913_v10, %v1232_v4  ;;  %v160_v28 = vmul.f32 %v1084_v6, %v1242_v8  ;;  %v446_v30 = vadd.f32 %v418_v63, %v359_v19  ;;  %v419_v34 = vmul.f32 %v1027_v16, %v1273_v22  ;;  %v1000_v2 = vld [vmem:[%s2254_s1 + $0x389] sm:$0x3f]  ;;  %v915_v11 = vld [vmem:[%s2254_s1 + $0xa1] sm:$0xff] }
  0x60   :  { %v1168_v29 = vclamps-f32 %v790_v17, 256.0  ;;  %v274_v33 = vadd.f32 %v246_v9, %v187_v21  ;;  %v705_v37 = vadd.f32 %v677_v13, %v618_v24  ;;  %v678_v38 = vmul.f32 %v1113_v20, %v1303_v40  ;;  %v1029_v17 = vld [vmem:[%s2254_s1 + $0x198] sm:$0x3f] }
  0x61   :  { %v101_v39 = vadd.f32 %v1234_v5, %v72_v27  ;;  %v247_v41 = vmul.f32 %v1113_v20, %v1251_v12  ;;  %v532_v44 = vadd.f32 %v504_v15, %v446_v30  ;;  %v764_v45 = vmul.f32 %v1142_v31, %v1322_v51  ;;  %v1115_v21 = vld [vmem:[%s2254_s1 + $0x291] sm:$0xff]  ;;  %v1058_v27 = vld [vmem:[%s2254_s1 + $0x199] sm:$0x3f] }
  0x62   :  { %874 = vst [vmem:[%s2255_s2 + $0x60] sm:$0xff] %v1168_v29  ;;  %v360_v46 = vadd.f32 %v332_v23, %v274_v33  ;;  %v505_v47 = vmul.f32 %v1056_v26, %v1289_v32  ;;  %v791_v50 = vadd.f32 %v763_v14, %v705_v37  ;;  %v592_v52 = vmul.f32 %v1085_v35, %v1296_v36 }
  0x63   :  { %v188_v53 = vadd.f32 %v160_v28, %v101_v39  ;;  %v333_v54 = vmul.f32 %v1142_v31, %v1264_v18  ;;  %v619_v56 = vadd.f32 %v591_v25, %v532_v44  ;;  %v73_v60 = vmul.f32 %v914_v42, %v1232_v4  ;;  %v1087_v28 = vld [vmem:[%s2254_s1 + $0x398] sm:$0x3f]  ;;  %v1030_v44 = vld [vmem:[%s2254_s1 + $0x1a0] sm:$0xff] }
  0x64   :  { %v447_v57 = vadd.f32 %v419_v34, %v360_v46  ;;  %v161_v61 = vmul.f32 %v942_v43, %v1242_v8  ;;  %v1169_v62 = vclamps-f32 %v791_v50, 256.0  ;;  %v679_v63 = vmul.f32 %v1114_v48, %v1303_v40  ;;  %v1144_v34 = vld [vmem:[%s2254_s1 + $0x391] sm:$0xff]  ;;  %v973_v50 = vld [vmem:[%s2254_s1 + $0x299] sm:$0x3f] }
  0x65   :  { %v275_v0 = vadd.f32 %v247_v41, %v188_v53  ;;  %v420_v1 = vmul.f32 %v1028_v49, %v1273_v22  ;;  %v706_v3 = vadd.f32 %v678_v38, %v619_v56  ;;  %v102_v9 = vadd.f32 %v1234_v5, %v73_v60  ;;  %v916_v38 = vld [vmem:[%s2254_s1 + $0xa9] sm:$0x3f]  ;;  %v1116_v53 = vld [vmem:[%s2254_s1 + $0x299] sm:$0x3f] }
  0x66   :  { %v533_v6 = vadd.f32 %v505_v47, %v447_v57  ;;  %v248_v10 = vmul.f32 %v971_v55, %v1251_v12  ;;  %875 = vst [vmem:[%s2255_s2 + $0x68] sm:$0x3f] %v1169_v62  ;;  %v765_v13 = vmul.f32 %v1143_v58, %v1322_v51  ;;  %v506_v15 = vmul.f32 %v1057_v59, %v1289_v32  ;;  %v1059_v57 = vld [vmem:[%s2254_s1 + $0x1a1] sm:$0xff] }
  0x67   :  { %v361_v14 = vadd.f32 %v333_v54, %v275_v0  ;;  %v593_v16 = vmul.f32 %v1086_v7, %v1296_v36  ;;  %v792_v19 = vadd.f32 %v764_v45, %v706_v3  ;;  %v189_v23 = vadd.f32 %v161_v61, %v102_v9  ;;  %v944_v45 = vld [vmem:[%s2254_s1 + $0x398] sm:$0x3f] }
  0x68   :  { %v620_v20 = vadd.f32 %v592_v52, %v533_v6  ;;  %v334_v24 = vmul.f32 %v1000_v2, %v1264_v18  ;;  %v680_v26 = vmul.f32 %v1115_v21, %v1303_v40  ;;  %v74_v29 = vmul.f32 %v915_v11, %v1232_v4  ;;  %v1145_v54 = vld [vmem:[%s2254_s1 + $0x399] sm:$0x3f]  ;;  %v1088_v2 = vld [vmem:[%s2254_s1 + $0x3a0] sm:$0xff] }
  0x69   :  { %v448_v25 = vadd.f32 %v420_v1, %v361_v14  ;;  %v162_v30 = vmul.f32 %v1086_v7, %v1242_v8  ;;  %v1170_v31 = vclamps-f32 %v792_v19, 256.0  ;;  %v276_v35 = vadd.f32 %v248_v10, %v189_v23  ;;  %v917_v7 = vld [vmem:[%s2254_s1 + $0xb1] sm:$0xff]  ;;  %v1031_v14 = vld [vmem:[%s2254_s1 + $0x1a8] sm:$0x3f] }
  0x6a   :  { %v707_v33 = vadd.f32 %v679_v63, %v620_v20  ;;  %v421_v37 = vmul.f32 %v1029_v17, %v1273_v22  ;;  %v766_v41 = vmul.f32 %v1144_v34, %v1322_v51  ;;  %v103_v42 = vadd.f32 %v1234_v5, %v74_v29  ;;  %v1002_v63 = vld [vmem:[%s2254_s1 + $0x399] sm:$0x3f]  ;;  %v1117_v17 = vld [vmem:[%s2254_s1 + $0x2a1] sm:$0xff] }
  0x6b   :  { %v534_v39 = vadd.f32 %v506_v15, %v448_v25  ;;  %v249_v43 = vmul.f32 %v1115_v21, %v1251_v12  ;;  %876 = vst [vmem:[%s2255_s2 + $0x70] sm:$0xff] %v1170_v31  ;;  %v362_v47 = vadd.f32 %v334_v24, %v276_v35  ;;  %v507_v48 = vmul.f32 %v1058_v27, %v1289_v32  ;;  %v1060_v24 = vld [vmem:[%s2254_s1 + $0x1a9] sm:$0x3f]  ;;  %v1146_v29 = vld [vmem:[%s2254_s1 + $0x3a1] sm:$0xff] }
  0x6c   :  { %v793_v46 = vadd.f32 %v765_v13, %v707_v33  ;;  %v594_v49 = vmul.f32 %v1087_v28, %v1296_v36  ;;  %v190_v55 = vadd.f32 %v162_v30, %v103_v42  ;;  %v335_v56 = vmul.f32 %v1144_v34, %v1264_v18  ;;  %v1089_v33 = vld [vmem:[%s2254_s1 + $0x3a8] sm:$0x3f] }
  0x6d   :  { %v621_v52 = vadd.f32 %v593_v16, %v534_v39  ;;  %v75_v58 = vmul.f32 %v916_v38, %v1232_v4  ;;  %v449_v60 = vadd.f32 %v421_v37, %v362_v47  ;;  %v422_v61 = vmul.f32 %v1030_v44, %v1273_v22  ;;  %v918_v39 = vld [vmem:[%s2254_s1 + $0xb9] sm:$0x3f]  ;;  %v1032_v47 = vld [vmem:[%s2254_s1 + $0x1b0] sm:$0xff] }
  0x6e   :  { %v1171_v59 = vclamps-f32 %v793_v46, 256.0  ;;  %v163_v62 = vmul.f32 %v944_v45, %v1242_v8  ;;  %v277_v1 = vadd.f32 %v249_v43, %v190_v55  ;;  %v250_v6 = vmul.f32 %v973_v50, %v1251_v12  ;;  %v1118_v46 = vld [vmem:[%s2254_s1 + $0x2a9] sm:$0x3f] }
  0x6f   :  { %v708_v0 = vadd.f32 %v680_v26, %v621_v52  ;;  %v104_v3 = vadd.f32 %v1234_v5, %v75_v58  ;;  %v535_v9 = vadd.f32 %v507_v48, %v449_v60  ;;  %v681_v10 = vmul.f32 %v1116_v53, %v1303_v40  ;;  %v975_v53 = vld [vmem:[%s2254_s1 + $0x2a9] sm:$0x3f] }
  0x70   :  { %877 = vst [vmem:[%s2255_s2 + $0x78] sm:$0x3f] %v1171_v59  ;;  %v767_v11 = vmul.f32 %v1145_v54, %v1322_v51  ;;  %v508_v13 = vmul.f32 %v1059_v57, %v1289_v32  ;;  %v363_v16 = vadd.f32 %v335_v56, %v277_v1  ;;  %v336_v20 = vmul.f32 %v1002_v63, %v1264_v18  ;;  %v1147_v56 = vld [vmem:[%s2254_s1 + $0x3a9] sm:$0x3f]  ;;  %v1061_v57 = vld [vmem:[%s2254_s1 + $0x1b1] sm:$0xff] }
  0x71   :  { %v794_v15 = vadd.f32 %v766_v41, %v708_v0  ;;  %v191_v19 = vadd.f32 %v163_v62, %v104_v3  ;;  %v622_v21 = vadd.f32 %v594_v49, %v535_v9  ;;  %v595_v23 = vmul.f32 %v1088_v2, %v1296_v36  ;;  %v946_v41 = vld [vmem:[%s2254_s1 + $0x3a8] sm:$0x3f]  ;;  %v1090_v3 = vld [vmem:[%s2254_s1 + $0x3b0] sm:$0xff] }
  0x72   :  { %v76_v25 = vmul.f32 %v917_v7, %v1232_v4  ;;  %v164_v26 = vmul.f32 %v1088_v2, %v1242_v8  ;;  %v450_v28 = vadd.f32 %v422_v61, %v363_v16  ;;  %v423_v31 = vmul.f32 %v1031_v14, %v1273_v22  ;;  %v1004_v0 = vld [vmem:[%s2254_s1 + $0x3a9] sm:$0x3f]  ;;  %v919_v9 = vld [vmem:[%s2254_s1 + $0xc1] sm:$0xff] }
  0x73   :  { %v1172_v27 = vclamps-f32 %v794_v15, 256.0  ;;  %v278_v30 = vadd.f32 %v250_v6, %v191_v19  ;;  %v709_v34 = vadd.f32 %v681_v10, %v622_v21  ;;  %v682_v35 = vmul.f32 %v1117_v17, %v1303_v40  ;;  %v1033_v15 = vld [vmem:[%s2254_s1 + $0x1b8] sm:$0x3f] }
  0x74   :  { %v105_v37 = vadd.f32 %v1234_v5, %v76_v25  ;;  %v251_v38 = vmul.f32 %v1117_v17, %v1251_v12  ;;  %v536_v42 = vadd.f32 %v508_v13, %v450_v28  ;;  %v768_v43 = vmul.f32 %v1146_v29, %v1322_v51  ;;  %v1119_v19 = vld [vmem:[%s2254_s1 + $0x2b1] sm:$0xff]  ;;  %v1062_v25 = vld [vmem:[%s2254_s1 + $0x1b9] sm:$0x3f] }
  0x75   :  { %878 = vst [vmem:[%s2255_s2 + $0x80] sm:$0xff] %v1172_v27  ;;  %v364_v44 = vadd.f32 %v336_v20, %v278_v30  ;;  %v509_v45 = vmul.f32 %v1060_v24, %v1289_v32  ;;  %v795_v48 = vadd.f32 %v767_v11, %v709_v34  ;;  %v596_v49 = vmul.f32 %v1089_v33, %v1296_v36 }
  0x76   :  { %v192_v50 = vadd.f32 %v164_v26, %v105_v37  ;;  %v337_v52 = vmul.f32 %v1146_v29, %v1264_v18  ;;  %v623_v54 = vadd.f32 %v595_v23, %v536_v42  ;;  %v77_v58 = vmul.f32 %v918_v39, %v1232_v4  ;;  %v1091_v26 = vld [vmem:[%s2254_s1 + $0x3b8] sm:$0x3f]  ;;  %v1034_v42 = vld [vmem:[%s2254_s1 + $0x1c0] sm:$0xff] }
  0x77   :  { %v451_v55 = vadd.f32 %v423_v31, %v364_v44  ;;  %v165_v59 = vmul.f32 %v946_v41, %v1242_v8  ;;  %v1173_v60 = vclamps-f32 %v795_v48, 256.0  ;;  %v683_v61 = vmul.f32 %v1118_v46, %v1303_v40  ;;  %v1148_v31 = vld [vmem:[%s2254_s1 + $0x3b1] sm:$0xff]  ;;  %v977_v48 = vld [vmem:[%s2254_s1 + $0x2b9] sm:$0x3f] }
  0x78   :  { %v279_v62 = vadd.f32 %v251_v38, %v192_v50  ;;  %v424_v63 = vmul.f32 %v1032_v47, %v1273_v22  ;;  %v710_v1 = vadd.f32 %v682_v35, %v623_v54  ;;  %v106_v6 = vadd.f32 %v1234_v5, %v77_v58  ;;  %v920_v35 = vld [vmem:[%s2254_s1 + $0xc9] sm:$0x3f]  ;;  %v1120_v50 = vld [vmem:[%s2254_s1 + $0x2b9] sm:$0x3f] }
  0x79   :  { %v537_v2 = vadd.f32 %v509_v45, %v451_v55  ;;  %v252_v7 = vmul.f32 %v975_v53, %v1251_v12  ;;  %879 = vst [vmem:[%s2255_s2 + $0x88] sm:$0x3f] %v1173_v60  ;;  %v769_v10 = vmul.f32 %v1147_v56, %v1322_v51  ;;  %v510_v13 = vmul.f32 %v1061_v57, %v1289_v32  ;;  %v1063_v55 = vld [vmem:[%s2254_s1 + $0x1c1] sm:$0xff] }
  0x7a   :  { %v365_v11 = vadd.f32 %v337_v52, %v279_v62  ;;  %v597_v14 = vmul.f32 %v1090_v3, %v1296_v36  ;;  %v796_v16 = vadd.f32 %v768_v43, %v710_v1  ;;  %v193_v20 = vadd.f32 %v165_v59, %v106_v6  ;;  %v948_v43 = vld [vmem:[%s2254_s1 + $0x3b8] sm:$0x3f] }
  0x7b   :  { %v624_v17 = vadd.f32 %v596_v49, %v537_v2  ;;  %v338_v21 = vmul.f32 %v1004_v0, %v1264_v18  ;;  %v684_v24 = vmul.f32 %v1119_v19, %v1303_v40  ;;  %v78_v27 = vmul.f32 %v919_v9, %v1232_v4  ;;  %v1149_v52 = vld [vmem:[%s2254_s1 + $0x3b9] sm:$0x3f]  ;;  %v1092_v0 = vld [vmem:[%s2254_s1 + $0x3c0] sm:$0xff] }
  0x7c   :  { %v452_v23 = vadd.f32 %v424_v63, %v365_v11  ;;  %v166_v28 = vmul.f32 %v1090_v3, %v1242_v8  ;;  %v1174_v29 = vclamps-f32 %v796_v16, 256.0  ;;  %v280_v33 = vadd.f32 %v252_v7, %v193_v20  ;;  %v921_v3 = vld [vmem:[%s2254_s1 + $0xd1] sm:$0xff]  ;;  %v1035_v11 = vld [vmem:[%s2254_s1 + $0x1c8] sm:$0x3f] }
  0x7d   :  { %v711_v30 = vadd.f32 %v683_v61, %v624_v17  ;;  %v425_v34 = vmul.f32 %v1033_v15, %v1273_v22  ;;  %v770_v38 = vmul.f32 %v1148_v31, %v1322_v51  ;;  %v107_v39 = vadd.f32 %v1234_v5, %v78_v27  ;;  %v1006_v61 = vld [vmem:[%s2254_s1 + $0x3b9] sm:$0x3f]  ;;  %v1121_v15 = vld [vmem:[%s2254_s1 + $0x2c1] sm:$0xff] }
  0x7e   :  { %v538_v37 = vadd.f32 %v510_v13, %v452_v23  ;;  %v253_v41 = vmul.f32 %v1119_v19, %v1251_v12  ;;  %880 = vst [vmem:[%s2255_s2 + $0x90] sm:$0xff] %v1174_v29  ;;  %v366_v45 = vadd.f32 %v338_v21, %v280_v33  ;;  %v511_v46 = vmul.f32 %v1062_v25, %v1289_v32  ;;  %v1064_v21 = vld [vmem:[%s2254_s1 + $0x1c9] sm:$0x3f]  ;;  %v1150_v27 = vld [vmem:[%s2254_s1 + $0x3c1] sm:$0xff] }
  0x7f   :  { %v797_v44 = vadd.f32 %v769_v10, %v711_v30  ;;  %v598_v47 = vmul.f32 %v1091_v26, %v1296_v36  ;;  %v194_v53 = vadd.f32 %v166_v28, %v107_v39  ;;  %v339_v54 = vmul.f32 %v1148_v31, %v1264_v18  ;;  %v1093_v30 = vld [vmem:[%s2254_s1 + $0x3c8] sm:$0x3f] }
  0x80   :  { %v625_v49 = vadd.f32 %v597_v14, %v538_v37  ;;  %v79_v56 = vmul.f32 %v920_v35, %v1232_v4  ;;  %v453_v58 = vadd.f32 %v425_v34, %v366_v45  ;;  %v426_v59 = vmul.f32 %v1034_v42, %v1273_v22  ;;  %v922_v37 = vld [vmem:[%s2254_s1 + $0xd9] sm:$0x3f]  ;;  %v1036_v45 = vld [vmem:[%s2254_s1 + $0x1d0] sm:$0xff] }
  0x81   :  { %v1175_v57 = vclamps-f32 %v797_v44, 256.0  ;;  %v167_v60 = vmul.f32 %v948_v43, %v1242_v8  ;;  %v281_v63 = vadd.f32 %v253_v41, %v194_v53  ;;  %v254_v2 = vmul.f32 %v977_v48, %v1251_v12  ;;  %v1122_v44 = vld [vmem:[%s2254_s1 + $0x2c9] sm:$0x3f] }
  0x82   :  { %v712_v62 = vadd.f32 %v684_v24, %v625_v49  ;;  %v108_v1 = vadd.f32 %v1234_v5, %v79_v56  ;;  %v539_v6 = vadd.f32 %v511_v46, %v453_v58  ;;  %v685_v7 = vmul.f32 %v1120_v50, %v1303_v40  ;;  %v979_v50 = vld [vmem:[%s2254_s1 + $0x2c9] sm:$0x3f] }
  0x83   :  { %881 = vst [vmem:[%s2255_s2 + $0x98] sm:$0x3f] %v1175_v57  ;;  %v771_v9 = vmul.f32 %v1149_v52, %v1322_v51  ;;  %v512_v10 = vmul.f32 %v1063_v55, %v1289_v32  ;;  %v367_v14 = vadd.f32 %v339_v54, %v281_v63  ;;  %v340_v17 = vmul.f32 %v1006_v61, %v1264_v18  ;;  %v1151_v54 = vld [vmem:[%s2254_s1 + $0x3c9] sm:$0x3f]  ;;  %v1065_v55 = vld [vmem:[%s2254_s1 + $0x1d1] sm:$0xff] }
  0x84   :  { %v798_v13 = vadd.f32 %v770_v38, %v712_v62  ;;  %v195_v16 = vadd.f32 %v167_v60, %v108_v1  ;;  %v626_v19 = vadd.f32 %v598_v47, %v539_v6  ;;  %v599_v20 = vmul.f32 %v1092_v0, %v1296_v36  ;;  %v950_v38 = vld [vmem:[%s2254_s1 + $0x3c8] sm:$0x3f]  ;;  %v1094_v1 = vld [vmem:[%s2254_s1 + $0x3d0] sm:$0xff] }
  0x85   :  { %v80_v23 = vmul.f32 %v921_v3, %v1232_v4  ;;  %v168_v24 = vmul.f32 %v1092_v0, %v1242_v8  ;;  %v454_v26 = vadd.f32 %v426_v59, %v367_v14  ;;  %v427_v29 = vmul.f32 %v1035_v11, %v1273_v22  ;;  %v1008_v62 = vld [vmem:[%s2254_s1 + $0x3c9] sm:$0x3f]  ;;  %v923_v6 = vld [vmem:[%s2254_s1 + $0xe1] sm:$0xff] }
  0x86   :  { %v1176_v25 = vclamps-f32 %v798_v13, 256.0  ;;  %v282_v28 = vadd.f32 %v254_v2, %v195_v16  ;;  %v713_v31 = vadd.f32 %v685_v7, %v626_v19  ;;  %v686_v33 = vmul.f32 %v1121_v15, %v1303_v40  ;;  %v1037_v13 = vld [vmem:[%s2254_s1 + $0x1d8] sm:$0x3f] }
  0x87   :  { %v109_v34 = vadd.f32 %v1234_v5, %v80_v23  ;;  %v255_v35 = vmul.f32 %v1121_v15, %v1251_v12  ;;  %v540_v39 = vadd.f32 %v512_v10, %v454_v26  ;;  %v772_v41 = vmul.f32 %v1150_v27, %v1322_v51  ;;  %v1123_v16 = vld [vmem:[%s2254_s1 + $0x2d1] sm:$0xff]  ;;  %v1066_v23 = vld [vmem:[%s2254_s1 + $0x1d9] sm:$0x3f] }
  0x88   :  { %882 = vst [vmem:[%s2255_s2 + $0xa0] sm:$0xff] %v1176_v25  ;;  %v368_v42 = vadd.f32 %v340_v17, %v282_v28  ;;  %v513_v43 = vmul.f32 %v1064_v21, %v1289_v32  ;;  %v799_v46 = vadd.f32 %v771_v9, %v713_v31  ;;  %v600_v47 = vmul.f32 %v1093_v30, %v1296_v36 }
  0x89   :  { %v196_v48 = vadd.f32 %v168_v24, %v109_v34  ;;  %v341_v49 = vmul.f32 %v1150_v27, %v1264_v18  ;;  %v627_v52 = vadd.f32 %v599_v20, %v540_v39  ;;  %v81_v56 = vmul.f32 %v922_v37, %v1232_v4  ;;  %v1095_v24 = vld [vmem:[%s2254_s1 + $0x3d8] sm:$0x3f]  ;;  %v1038_v39 = vld [vmem:[%s2254_s1 + $0x1e0] sm:$0xff] }
  0x8a   :  { %v455_v53 = vadd.f32 %v427_v29, %v368_v42  ;;  %v169_v57 = vmul.f32 %v950_v38, %v1242_v8  ;;  %v1177_v58 = vclamps-f32 %v799_v46, 256.0  ;;  %v687_v59 = vmul.f32 %v1122_v44, %v1303_v40  ;;  %v1152_v29 = vld [vmem:[%s2254_s1 + $0x3d1] sm:$0xff]  ;;  %v981_v46 = vld [vmem:[%s2254_s1 + $0x2d9] sm:$0x3f] }
  0x8b   :  { %v283_v60 = vadd.f32 %v255_v35, %v196_v48  ;;  %v428_v61 = vmul.f32 %v1036_v45, %v1273_v22  ;;  %v714_v63 = vadd.f32 %v686_v33, %v627_v52  ;;  %v110_v2 = vadd.f32 %v1234_v5, %v81_v56  ;;  %v924_v33 = vld [vmem:[%s2254_s1 + $0xe9] sm:$0x3f]  ;;  %v1124_v48 = vld [vmem:[%s2254_s1 + $0x2d9] sm:$0x3f]  ;;  %v1067_v52 = vld [vmem:[%s2254_s1 + $0x1e1] sm:$0xff] }
  0x8c   :  { %v541_v0 = vadd.f32 %v513_v43, %v455_v53  ;;  %v256_v3 = vmul.f32 %v979_v50, %v1251_v12  ;;  %883 = vst [vmem:[%s2255_s2 + $0xa8] sm:$0x3f] %v1177_v58  ;;  %v773_v7 = vmul.f32 %v1151_v54, %v1322_v51  ;;  %v514_v10 = vmul.f32 %v1065_v55, %v1289_v32  ;;  %v1010_v58 = vld [vmem:[%s2254_s1 + $0x3d9] sm:$0x3f] }
  0x8d   :  { %v369_v9 = vadd.f32 %v341_v49, %v283_v60  ;;  %v601_v11 = vmul.f32 %v1094_v1, %v1296_v36  ;;  %v800_v14 = vadd.f32 %v772_v41, %v714_v63  ;;  %v197_v17 = vadd.f32 %v169_v57, %v110_v2  ;;  %v952_v41 = vld [vmem:[%s2254_s1 + $0x3d8] sm:$0x3f]  ;;  %v1039_v2 = vld [vmem:[%s2254_s1 + $0x1e8] sm:$0x3f] }
  0x8e   :  { %v628_v15 = vadd.f32 %v600_v47, %v541_v0  ;;  %v342_v19 = vmul.f32 %v1008_v62, %v1264_v18  ;;  %v688_v21 = vmul.f32 %v1123_v16, %v1303_v40  ;;  %v82_v25 = vmul.f32 %v923_v6, %v1232_v4  ;;  %v1153_v60 = vld [vmem:[%s2254_s1 + $0x3d9] sm:$0x3f] }
  0x8f   :  { %v456_v20 = vadd.f32 %v428_v61, %v369_v9  ;;  %v170_v26 = vmul.f32 %v1094_v1, %v1242_v8  ;;  %v1178_v27 = vclamps-f32 %v800_v14, 256.0  ;;  %v284_v30 = vadd.f32 %v256_v3, %v197_v17 }
  0x90   :  { %v715_v28 = vadd.f32 %v687_v59, %v628_v15  ;;  %v429_v31 = vmul.f32 %v1037_v13, %v1273_v22  ;;  %v774_v35 = vmul.f32 %v1152_v29, %v1322_v51  ;;  %v111_v37 = vadd.f32 %v1234_v5, %v82_v25  ;;  %v1068_v13 = vld [vmem:[%s2254_s1 + $0x1e9] sm:$0x3f] }
  0x91   :  { %v542_v34 = vadd.f32 %v514_v10, %v456_v20  ;;  %v257_v38 = vmul.f32 %v1123_v16, %v1251_v12  ;;  %884 = vst [vmem:[%s2255_s2 + $0xb0] sm:$0xff] %v1178_v27  ;;  %v370_v43 = vadd.f32 %v342_v19, %v284_v30  ;;  %v515_v44 = vmul.f32 %v1066_v23, %v1289_v32  ;;  %v1097_v20 = vld [vmem:[%s2254_s1 + $0x3e8] sm:$0x3f] }
  0x92   :  { %v801_v42 = vadd.f32 %v773_v7, %v715_v28  ;;  %v602_v45 = vmul.f32 %v1095_v24, %v1296_v36  ;;  %v198_v49 = vadd.f32 %v170_v26, %v111_v37  ;;  %v343_v50 = vmul.f32 %v1152_v29, %v1264_v18  ;;  %v1126_v26 = vld [vmem:[%s2254_s1 + $0x2e9] sm:$0x3f] }
  0x93   :  { %v629_v47 = vadd.f32 %v601_v11, %v542_v34  ;;  %v83_v53 = vmul.f32 %v924_v33, %v1232_v4  ;;  %v457_v55 = vadd.f32 %v429_v31, %v370_v43  ;;  %v430_v56 = vmul.f32 %v1038_v39, %v1273_v22  ;;  %v1096_v4 = vld [vmem:[%s2254_s1 + $0x3e0] sm:$0xff]  ;;  %v1155_v33 = vld [vmem:[%s2254_s1 + $0x3e9] sm:$0x3f] }
  0x94   :  { %v1179_v54 = vclamps-f32 %v801_v42, 256.0  ;;  %v171_v57 = vmul.f32 %v952_v41, %v1242_v8  ;;  %v285_v61 = vadd.f32 %v257_v38, %v198_v49  ;;  %v258_v63 = vmul.f32 %v981_v46, %v1251_v12  ;;  %v1125_v11 = vld [vmem:[%s2254_s1 + $0x2e1] sm:$0xff] }
  0x95   :  { %v716_v59 = vadd.f32 %v688_v21, %v629_v47  ;;  %v112_v62 = vadd.f32 %v1234_v5, %v83_v53  ;;  %v543_v8 = vadd.f32 %v515_v44, %v457_v55  ;;  %v689_v0 = vmul.f32 %v1124_v48, %v1303_v40 }
  0x96   :  { %885 = vst [vmem:[%s2255_s2 + $0xb8] sm:$0x3f] %v1179_v54  ;;  %v516_v1 = vmul.f32 %v1067_v52, %v1289_v32  ;;  %v371_v6 = vadd.f32 %v343_v50, %v285_v61  ;;  %v344_v5 = vmul.f32 %v1010_v58, %v1264_v18  ;;  %v775_v12 = vmul.f32 %v1153_v60, %v1322_v51  ;;  %v1154_v18 = vld [vmem:[%s2254_s1 + $0x3e1] sm:$0xff] }
  0x97   :  { %v802_v3 = vadd.f32 %v774_v35, %v716_v59  ;;  %v199_v7 = vadd.f32 %v171_v57, %v112_v62  ;;  %v630_v9 = vadd.f32 %v602_v45, %v543_v8  ;;  %v603_v10 = vmul.f32 %v1096_v4, %v1296_v36 }
  0x98   :  { %v458_v15 = vadd.f32 %v430_v56, %v371_v6  ;;  %v431_v17 = vmul.f32 %v1039_v2, %v1273_v22  ;;  %v690_v23 = vmul.f32 %v1125_v11, %v1303_v40  ;;  %v517_v25 = vmul.f32 %v1068_v13, %v1289_v32 }
  0x99   :  { %v1180_v14 = vclamps-f32 %v802_v3, 256.0  ;;  %v286_v16 = vadd.f32 %v258_v63, %v199_v7  ;;  %v717_v19 = vadd.f32 %v689_v0, %v630_v9  ;;  %v776_v28 = vmul.f32 %v1154_v18, %v1322_v51 }
  0x9a   :  { %v544_v21 = vadd.f32 %v516_v1, %v458_v15  ;;  %v604_v30 = vmul.f32 %v1097_v20, %v1296_v36  ;;  %v691_v32 = vmul.f32 %v1126_v26, %v1303_v40  ;;  %v777_v39 = vmul.f32 %v1155_v33, %v1322_v51 }
  0x9b   :  { %886 = vst [vmem:[%s2255_s2 + $0xc0] sm:$0xff] %v1180_v14  ;;  %v372_v24 = vadd.f32 %v344_v5, %v286_v16  ;;  %v803_v22 = vadd.f32 %v775_v12, %v717_v19 }
  0x9c   :  { %v631_v27 = vadd.f32 %v603_v10, %v544_v21 }
  0x9d   :  { %v459_v29 = vadd.f32 %v431_v17, %v372_v24  ;;  %v1181_v31 = vclamps-f32 %v803_v22, 256.0 }
  0x9e   :  { %v718_v34 = vadd.f32 %v690_v23, %v631_v27 }
  0x9f   :  { %v545_v35 = vadd.f32 %v517_v25, %v459_v29  ;;  %887 = vst [vmem:[%s2255_s2 + $0xc8] sm:$0x3f] %v1181_v31 }
  0xa0   :  { %v804_v37 = vadd.f32 %v776_v28, %v718_v34 }
  0xa1   :  { %v632_v38 = vadd.f32 %v604_v30, %v545_v35 }
  0xa2   :  { %v1182_v41 = vclamps-f32 %v804_v37, 256.0 }
  0xa3   :  { %v719_v42 = vadd.f32 %v691_v32, %v632_v38 }
  0xa4   :  { %888 = vst [vmem:[%s2255_s2 + $0xd0] sm:$0xff] %v1182_v41 }
  0xa5   :  { %v805_v36 = vadd.f32 %v777_v39, %v719_v42 }
  0xa7   :  { %v1183_v43 = vclamps-f32 %v805_v36, 256.0 }
  0xa9   :  { %889 = vst [vmem:[%s2255_s2 + $0xd8] sm:$0x3f] %v1183_v43 }
  0xaa   :  { %894 = vsyncpa [#allocation3], 1 }

</bundles_post_ra>
